<compile_context>
chip_gen: v5e
topology: v5e:2x2
jax: 0.10.0
libtpu: 0.0.40
codegen_flags: <defaults>
</compile_context>

<pallas_src>
import functools

import jax
import jax.numpy as jnp
from jax import lax
from jax.experimental import pallas as pl
from jax.experimental.pallas import tpu as pltpu

_LANES = 128


def _round_up(x, m):
    return ((x + m - 1) // m) * m


def _tensorcores_per_device():
    """2 TensorCores share one device on megacore-style chips (v4/v5p/v7x); else 1.

    Heuristic affects performance only — the kernel is correct for any value."""
    try:
        kind = jax.devices()[0].device_kind.lower()
    except Exception:
        return 1
    if any(tag in kind for tag in ("v4", "v5p", "v7", "7x")):
        return 2
    return 1


def _ls_bce_kernel(pred_ref, tgt_ref, out_p_ref, out_nbce_ref,
                   acc_p_ref, acc_nbce_ref, *,
                   steps_per_core, n_valid_rows, chunk_rows):
    s = pl.program_id(1)

    @pl.when(s == 0)
    def _init():
        acc_p_ref[...] = jnp.zeros_like(acc_p_ref)
        acc_nbce_ref[...] = jnp.zeros_like(acc_nbce_ref)

    tr, lanes = pred_ref.shape                      # rows per block (multiple of chunk_rows)
    n_chunks = tr // chunk_rows                     # static
    step = pl.program_id(0) * steps_per_core + s    # logical block index (may exceed num_blocks)

    def chunk_vals(ci):
        off = pl.multiple_of(ci * chunk_rows, chunk_rows)
        p = pred_ref[pl.ds(off, chunk_rows), :].astype(jnp.float32)
        t = tgt_ref[pl.ds(off, chunk_rows), :].astype(jnp.float32)
        # PyTorch BCE clamps both logs at -100.  nbce = -(elementwise BCE):
        #   t*log(p) + (1-t)*log(1-p) == t*(log(p) - log(1-p)) + log(1-p)
        log_p = jnp.maximum(jnp.log(p), -100.0)
        log_1mp = jnp.maximum(jnp.log(1.0 - p), -100.0)
        nbce = t * (log_p - log_1mp) + log_1mp
        return p, nbce

    def accumulate(p, nbce):
        # Free reshape (splits major dim only) + vreg-wise adds; cross-lane reduce in wrapper.
        acc_p_ref[...] += p.reshape(chunk_rows // 8, 8, lanes).sum(axis=0)
        acc_nbce_ref[...] += nbce.reshape(chunk_rows // 8, 8, lanes).sum(axis=0)

    is_full = (step + 1) * tr <= n_valid_rows

    @pl.when(is_full)
    def _full_block():
        # Hot path: every row is valid -> no iota / compare / select work at all.
        def body(ci, carry):
            p, nbce = chunk_vals(ci)
            accumulate(p, nbce)
            return carry
        lax.fori_loop(0, n_chunks, body, 0, unroll=True)

    @pl.when(jnp.logical_not(is_full))
    def _tail_block():
        # Tail block (or clamped excess step of the parallel split): mask invalid rows.
        # select() semantics stop NaN/Inf from garbage rows propagating.
        def body(ci, carry):
            p, nbce = chunk_vals(ci)
            row = lax.broadcasted_iota(jnp.int32, (chunk_rows, lanes), 0)
            valid = (step * tr + ci * chunk_rows + row) < n_valid_rows
            accumulate(jnp.where(valid, p, 0.0), jnp.where(valid, nbce, 0.0))
            return carry
        lax.fori_loop(0, n_chunks, body, 0, unroll=True)

    @pl.when(s == pl.num_programs(1) - 1)
    def _finalize():
        out_p_ref[...] = acc_p_ref[...]
        out_nbce_ref[...] = acc_nbce_ref[...]


def label_smoothing_cross_entropy(output, target, *, eps=0.1, reduction="mean",
                                  ignore_index=-100, block_rows=4096,
                                  chunk_rows=256, num_cores=None):
    """Pallas TPU implementation of LabelSmoothingCrossEntropy.forward ('mean' / 'sum')."""
    if reduction not in ("mean", "sum"):
        raise NotImplementedError("only reduction='mean' and 'sum' are implemented")
    del ignore_index  # stored but never used by the reference forward

    assert output.shape == target.shape
    c = output.shape[-1]
    numel = int(output.size)
    n_rows_mean = numel // c                      # number of "rows" for the smooth-term mean

    # Free, contiguous 2-D view -- no jnp.pad, no HBM copy.  Lane-dense (R,128) when possible,
    # otherwise natural (numel/c, c) view (block last dim == full dim satisfies (8,128) rule).
    lanes = _LANES if (numel % _LANES == 0) else c
    rows = numel // lanes
    p2 = output.reshape(rows, lanes)
    t2 = target.reshape(rows, lanes)

    n_cores = int(num_cores) if num_cores is not None else _tensorcores_per_device()
    n_cores = max(1, n_cores)

    # Tile sizing: big row blocks amortize per-grid-step overhead; inner chunk bounds live ranges.
    cr = max(8, (min(int(chunk_rows), int(block_rows)) // 8) * 8)
    tr = min(int(block_rows), _round_up(rows, 8))
    tr = max(8, (tr // 8) * 8)
    if tr >= cr:
        tr = (tr // cr) * cr                       # make block a multiple of the chunk
    else:
        cr = tr
    num_blocks = int(pl.cdiv(rows, tr))
    steps_per_core = int(pl.cdiv(num_blocks, n_cores))

    def in_map(pc, s):
        # Clamp so excess steps of the parallel split re-read a valid block; their contribution
        # is zeroed by the in-kernel tail mask (logical step >= num_blocks).
        return (jnp.minimum(pc * steps_per_core + s, num_blocks - 1), 0)

    out_map = lambda pc, s: (pc, 0, 0)

    kernel = functools.partial(
        _ls_bce_kernel,
        steps_per_core=steps_per_core,
        n_valid_rows=int(rows),
        chunk_rows=int(cr),
    )

    # Explicit VMEM budget: 2 inputs x double-buffered blocks (+ headroom).  v5e's default
    # scoped VMEM (16 MiB) is too tight for 4096-row f32 blocks; raise it explicitly.
    dbl_buf_bytes = 2 * tr * lanes * (output.dtype.itemsize + target.dtype.itemsize)
    vmem_limit = int(max(32 * 1024 * 1024, dbl_buf_bytes + (16 * 1024 * 1024)))

    out_p, out_nbce = pl.pallas_call(
        kernel,
        out_shape=(jax.ShapeDtypeStruct((n_cores, 8, lanes), jnp.float32),
                   jax.ShapeDtypeStruct((n_cores, 8, lanes), jnp.float32)),
        grid_spec=pltpu.PrefetchScalarGridSpec(
            num_scalar_prefetch=0,
            grid=(n_cores, steps_per_core),
            in_specs=[
                pl.BlockSpec((tr, lanes), in_map),
                pl.BlockSpec((tr, lanes), in_map),
            ],
            out_specs=(
                pl.BlockSpec((None, 8, lanes), out_map),
                pl.BlockSpec((None, 8, lanes), out_map),
            ),
            scratch_shapes=[
                pltpu.VMEM((8, lanes), jnp.float32),   # partial sum(p)
                pltpu.VMEM((8, lanes), jnp.float32),   # partial sum(-bce elementwise)
            ],
        ),
        compiler_params=pltpu.CompilerParams(
            dimension_semantics=("parallel", "arbitrary"),
            vmem_limit_bytes=vmem_limit,
        ),
    )(p2, t2)

    sum_p = jnp.sum(out_p)        # tiny (n_cores*8*lanes) reductions done by XLA
    sum_nbce = jnp.sum(out_nbce)  # = -sum(elementwise BCE); sign folded in below

    if reduction == "mean":
        smooth = -sum_p / float(n_rows_mean)
        bce = -sum_nbce / float(numel)
    else:  # 'sum'
        smooth = -sum_p
        bce = -sum_nbce
    return smooth * (float(eps) / float(c)) + (1.0 - float(eps)) * bce


def _reference_loss(output, target, *, eps=0.1, reduction="mean"):
    c = output.shape[-1]
    p = output.astype(jnp.float32)
    t = target.astype(jnp.float32)
    log_p = jnp.maximum(jnp.log(p), -100.0)
    log_1mp = jnp.maximum(jnp.log(1.0 - p), -100.0)
    bce_el = -(t * log_p + (1.0 - t) * log_1mp)
    if reduction == "sum":
        smooth = -jnp.sum(p)
        bce = jnp.sum(bce_el)
    else:
        smooth = jnp.mean(-jnp.sum(p, axis=-1))
        bce = jnp.mean(bce_el)
    return smooth * eps / c + (1.0 - eps) * bce


if __name__ == "__main__":
    key = jax.random.PRNGKey(0)
    k1, k2, k3, k4 = jax.random.split(key, 4)

    # Primary case: batch=2, seq=8, num_labels=32 -> lane-dense (R,128) path, tail-masked block.
    bs, ml, c = 2, 8, 32
    probs = jax.nn.sigmoid(jax.random.normal(k1, (bs, ml, c), dtype=jnp.float32))
    target = (jax.random.uniform(k2, (bs, ml, c)) > 0.5).astype(jnp.float32)

    loss = label_smoothing_cross_entropy(probs, target, eps=0.1, reduction="mean",
                                         ignore_index=-100)
    loss = jax.block_until_ready(loss)
    ref = _reference_loss(probs, target, eps=0.1, reduction="mean")
    assert bool(jnp.isfinite(loss)), loss
    assert bool(jnp.allclose(loss, ref, rtol=1e-5, atol=1e-5)), (loss, ref)

    # reduction='sum'
    loss_s = jax.block_until_ready(
        label_smoothing_cross_entropy(probs, target, eps=0.1, reduction="sum"))
    ref_s = _reference_loss(probs, target, eps=0.1, reduction="sum")
    assert bool(jnp.allclose(loss_s, ref_s, rtol=1e-5, atol=1e-5)), (loss_s, ref_s)

    # Ragged case (numel % 128 != 0): natural (rows, c) view, no padding/copies, full fast path.
    bs2, ml2, c2 = 4, 10, 20
    probs2 = jax.nn.sigmoid(jax.random.normal(k3, (bs2, ml2, c2), dtype=jnp.float32))
    target2 = (jax.random.uniform(k4, (bs2, ml2, c2)) > 0.5).astype(jnp.float32)
    loss2 = jax.block_until_ready(
        label_smoothing_cross_entropy(probs2, target2, eps=0.1, reduction="mean"))
    ref2 = _reference_loss(probs2, target2, eps=0.1, reduction="mean")
    assert bool(jnp.allclose(loss2, ref2, rtol=1e-5, atol=1e-5)), (loss2, ref2)

    print("KERNEL_OK")
</pallas_src>

<mosaic_0001>
module attributes {stable_mosaic.version = 11 : i64} {
  func.func @_ls_bce_kernel(%arg0: i32, %arg1: i32, %arg2: memref<8x128xf32, #tpu.memory_space<vmem>>, %arg3: memref<8x128xf32, #tpu.memory_space<vmem>>, %arg4: memref<1x8x128xf32, #tpu.memory_space<vmem>>, %arg5: memref<1x8x128xf32, #tpu.memory_space<vmem>>, %arg6: memref<8x128xf32, #tpu.memory_space<vmem>>, %arg7: memref<8x128xf32, #tpu.memory_space<vmem>>) attributes {dimension_semantics = [#tpu.dimension_semantics<parallel>, #tpu.dimension_semantics<arbitrary>], iteration_bounds = array<i64: 1, 1>, scalar_prefetch = 0 : i64, scratch_operands = 2 : i64, tpu.core_type = #tpu.core_type<tc>, window_params = [{transform_indices = @transform_0, window_bounds = array<i64: 8, 128>}, {transform_indices = @transform_1, window_bounds = array<i64: 8, 128>}, {transform_indices = @transform_2, window_bounds = array<i64: 1, 8, 128>}, {transform_indices = @transform_3, window_bounds = array<i64: 1, 8, 128>}]} {
    %c0_i32 = arith.constant 0 : i32
    %0 = arith.cmpi eq, %arg1, %c0_i32 : i32
    %1 = arith.extui %0 : i1 to i32
    %c0_i32_0 = arith.constant 0 : i32
    %2 = arith.cmpi ne, %1, %c0_i32_0 : i32
    scf.if %2 {
      %cst = arith.constant 0.000000e+00 : f32
      %16 = vector.broadcast %cst : f32 to vector<8x128xf32>
      %c0 = arith.constant 0 : index
      %c0_6 = arith.constant 0 : index
      %17 = vector.load %arg6[%c0, %c0_6] : memref<8x128xf32, #tpu.memory_space<vmem>>, vector<8x128xf32>
      tpu.vector_store %arg6[%c0, %c0_6], %16 {strides = array<i32>} : memref<8x128xf32, #tpu.memory_space<vmem>>, vector<8x128xf32>,
      %cst_7 = arith.constant 0.000000e+00 : f32
      %18 = vector.broadcast %cst_7 : f32 to vector<8x128xf32>
      %c0_8 = arith.constant 0 : index
      %c0_9 = arith.constant 0 : index
      %19 = vector.load %arg7[%c0_8, %c0_9] : memref<8x128xf32, #tpu.memory_space<vmem>>, vector<8x128xf32>
      tpu.vector_store %arg7[%c0_8, %c0_9], %18 {strides = array<i32>} : memref<8x128xf32, #tpu.memory_space<vmem>>, vector<8x128xf32>,
    } else {
    }
    %c1_i32 = arith.constant 1 : i32
    %3 = arith.muli %arg0, %c1_i32 : i32
    %4 = arith.addi %3, %arg1 : i32
    %c1_i32_1 = arith.constant 1 : i32
    %5 = arith.addi %4, %c1_i32_1 : i32
    %c8_i32 = arith.constant 8 : i32
    %6 = arith.muli %5, %c8_i32 : i32
    %c4_i32 = arith.constant 4 : i32
    %7 = arith.cmpi sle, %6, %c4_i32 : i32
    %8 = arith.extui %7 : i1 to i32
    %c0_i32_2 = arith.constant 0 : i32
    %9 = arith.cmpi ne, %8, %c0_i32_2 : i32
    scf.if %9 {
      %c0_i32_6 = arith.constant 0 : i32
      %c8_i32_7 = arith.constant 8 : i32
      %16 = arith.muli %c0_i32_6, %c8_i32_7 : i32
      %17 = tpu.assume_multiple %16, 8 : i32
      %18 = arith.index_cast %17 : i32 to index
      %c0 = arith.constant 0 : index
      %19 = vector.load %arg2[%18, %c0] : memref<8x128xf32, #tpu.memory_space<vmem>>, vector<8x128xf32>
      %20 = arith.index_cast %17 : i32 to index
      %c0_8 = arith.constant 0 : index
      %21 = vector.load %arg3[%20, %c0_8] : memref<8x128xf32, #tpu.memory_space<vmem>>, vector<8x128xf32>
      %22 = math.log %19 : vector<8x128xf32>
      %cst = arith.constant -1.000000e+02 : f32
      %23 = vector.broadcast %cst : f32 to vector<8x128xf32>
      %24 = arith.maximumf %22, %23 : vector<8x128xf32>
      %cst_9 = arith.constant 1.000000e+00 : f32
      %25 = vector.broadcast %cst_9 : f32 to vector<8x128xf32>
      %26 = arith.subf %25, %19 : vector<8x128xf32>
      %27 = math.log %26 : vector<8x128xf32>
      %cst_10 = arith.constant -1.000000e+02 : f32
      %28 = vector.broadcast %cst_10 : f32 to vector<8x128xf32>
      %29 = arith.maximumf %27, %28 : vector<8x128xf32>
      %30 = arith.subf %24, %29 : vector<8x128xf32>
      %31 = arith.mulf %21, %30 : vector<8x128xf32>
      %32 = arith.addf %31, %29 : vector<8x128xf32>
      %c0_11 = arith.constant 0 : index
      %c0_12 = arith.constant 0 : index
      %33 = vector.load %arg6[%c0_11, %c0_12] : memref<8x128xf32, #tpu.memory_space<vmem>>, vector<8x128xf32>
      %34 = vector.shape_cast %19 : vector<8x128xf32> to vector<1x8x128xf32>
      %cst_13 = arith.constant dense<0.000000e+00> : vector<8x128xf32>
      %35 = vector.multi_reduction <add>, %34, %cst_13 [0] : vector<1x8x128xf32> to vector<8x128xf32>
      %36 = arith.addf %33, %35 : vector<8x128xf32>
      %c0_14 = arith.constant 0 : index
      %c0_15 = arith.constant 0 : index
      %37 = vector.load %arg6[%c0_14, %c0_15] : memref<8x128xf32, #tpu.memory_space<vmem>>, vector<8x128xf32>
      tpu.vector_store %arg6[%c0_14, %c0_15], %36 {strides = array<i32>} : memref<8x128xf32, #tpu.memory_space<vmem>>, vector<8x128xf32>,
      %c0_16 = arith.constant 0 : index
      %c0_17 = arith.constant 0 : index
      %38 = vector.load %arg7[%c0_16, %c0_17] : memref<8x128xf32, #tpu.memory_space<vmem>>, vector<8x128xf32>
      %39 = vector.shape_cast %32 : vector<8x128xf32> to vector<1x8x128xf32>
      %cst_18 = arith.constant dense<0.000000e+00> : vector<8x128xf32>
      %40 = vector.multi_reduction <add>, %39, %cst_18 [0] : vector<1x8x128xf32> to vector<8x128xf32>
      %41 = arith.addf %38, %40 : vector<8x128xf32>
      %c0_19 = arith.constant 0 : index
      %c0_20 = arith.constant 0 : index
      %42 = vector.load %arg7[%c0_19, %c0_20] : memref<8x128xf32, #tpu.memory_space<vmem>>, vector<8x128xf32>
      tpu.vector_store %arg7[%c0_19, %c0_20], %41 {strides = array<i32>} : memref<8x128xf32, #tpu.memory_space<vmem>>, vector<8x128xf32>,
      %c1_i32_21 = arith.constant 1 : i32
    } else {
    }
    %true = arith.constant true
    %10 = arith.xori %7, %true : i1
    %11 = arith.extui %10 : i1 to i32
    %c0_i32_3 = arith.constant 0 : i32
    %12 = arith.cmpi ne, %11, %c0_i32_3 : i32
    scf.if %12 {
      %c0_i32_6 = arith.constant 0 : i32
      %c8_i32_7 = arith.constant 8 : i32
      %16 = arith.muli %c0_i32_6, %c8_i32_7 : i32
      %17 = tpu.assume_multiple %16, 8 : i32
      %18 = arith.index_cast %17 : i32 to index
      %c0 = arith.constant 0 : index
      %19 = vector.load %arg2[%18, %c0] : memref<8x128xf32, #tpu.memory_space<vmem>>, vector<8x128xf32>
      %20 = arith.index_cast %17 : i32 to index
      %c0_8 = arith.constant 0 : index
      %21 = vector.load %arg3[%20, %c0_8] : memref<8x128xf32, #tpu.memory_space<vmem>>, vector<8x128xf32>
      %22 = math.log %19 : vector<8x128xf32>
      %cst = arith.constant -1.000000e+02 : f32
      %23 = vector.broadcast %cst : f32 to vector<8x128xf32>
      %24 = arith.maximumf %22, %23 : vector<8x128xf32>
      %cst_9 = arith.constant 1.000000e+00 : f32
      %25 = vector.broadcast %cst_9 : f32 to vector<8x128xf32>
      %26 = arith.subf %25, %19 : vector<8x128xf32>
      %27 = math.log %26 : vector<8x128xf32>
      %cst_10 = arith.constant -1.000000e+02 : f32
      %28 = vector.broadcast %cst_10 : f32 to vector<8x128xf32>
      %29 = arith.maximumf %27, %28 : vector<8x128xf32>
      %30 = arith.subf %24, %29 : vector<8x128xf32>
      %31 = arith.mulf %21, %30 : vector<8x128xf32>
      %32 = arith.addf %31, %29 : vector<8x128xf32>
      %33 = tpu.iota {dimensions = array<i32: 0>} : vector<8x128xi32>
      %c8_i32_11 = arith.constant 8 : i32
      %34 = arith.muli %4, %c8_i32_11 : i32
      %c8_i32_12 = arith.constant 8 : i32
      %35 = arith.muli %c0_i32_6, %c8_i32_12 : i32
      %36 = arith.addi %34, %35 : i32
      %37 = vector.broadcast %36 : i32 to vector<8x128xi32>
      %38 = arith.addi %37, %33 : vector<8x128xi32>
      %c4_i32_13 = arith.constant 4 : i32
      %39 = vector.broadcast %c4_i32_13 : i32 to vector<8x128xi32>
      %40 = arith.cmpi slt, %38, %39 : vector<8x128xi32>
      %cst_14 = arith.constant 0.000000e+00 : f32
      %41 = vector.broadcast %cst_14 : f32 to vector<8x128xf32>
      %42 = arith.select %40, %19, %41 : vector<8x128xi1>, vector<8x128xf32>
      %cst_15 = arith.constant 0.000000e+00 : f32
      %43 = vector.broadcast %cst_15 : f32 to vector<8x128xf32>
      %44 = arith.select %40, %32, %43 : vector<8x128xi1>, vector<8x128xf32>
      %c0_16 = arith.constant 0 : index
      %c0_17 = arith.constant 0 : index
      %45 = vector.load %arg6[%c0_16, %c0_17] : memref<8x128xf32, #tpu.memory_space<vmem>>, vector<8x128xf32>
      %46 = vector.shape_cast %42 : vector<8x128xf32> to vector<1x8x128xf32>
      %cst_18 = arith.constant dense<0.000000e+00> : vector<8x128xf32>
      %47 = vector.multi_reduction <add>, %46, %cst_18 [0] : vector<1x8x128xf32> to vector<8x128xf32>
      %48 = arith.addf %45, %47 : vector<8x128xf32>
      %c0_19 = arith.constant 0 : index
      %c0_20 = arith.constant 0 : index
      %49 = vector.load %arg6[%c0_19, %c0_20] : memref<8x128xf32, #tpu.memory_space<vmem>>, vector<8x128xf32>
      tpu.vector_store %arg6[%c0_19, %c0_20], %48 {strides = array<i32>} : memref<8x128xf32, #tpu.memory_space<vmem>>, vector<8x128xf32>,
      %c0_21 = arith.constant 0 : index
      %c0_22 = arith.constant 0 : index
      %50 = vector.load %arg7[%c0_21, %c0_22] : memref<8x128xf32, #tpu.memory_space<vmem>>, vector<8x128xf32>
      %51 = vector.shape_cast %44 : vector<8x128xf32> to vector<1x8x128xf32>
      %cst_23 = arith.constant dense<0.000000e+00> : vector<8x128xf32>
      %52 = vector.multi_reduction <add>, %51, %cst_23 [0] : vector<1x8x128xf32> to vector<8x128xf32>
      %53 = arith.addf %50, %52 : vector<8x128xf32>
      %c0_24 = arith.constant 0 : index
      %c0_25 = arith.constant 0 : index
      %54 = vector.load %arg7[%c0_24, %c0_25] : memref<8x128xf32, #tpu.memory_space<vmem>>, vector<8x128xf32>
      tpu.vector_store %arg7[%c0_24, %c0_25], %53 {strides = array<i32>} : memref<8x128xf32, #tpu.memory_space<vmem>>, vector<8x128xf32>,
      %c1_i32_26 = arith.constant 1 : i32
    } else {
    }
    %c0_i32_4 = arith.constant 0 : i32
    %13 = arith.cmpi eq, %arg1, %c0_i32_4 : i32
    %14 = arith.extui %13 : i1 to i32
    %c0_i32_5 = arith.constant 0 : i32
    %15 = arith.cmpi ne, %14, %c0_i32_5 : i32
    scf.if %15 {
      %c0 = arith.constant 0 : index
      %c0_6 = arith.constant 0 : index
      %16 = vector.load %arg6[%c0, %c0_6] : memref<8x128xf32, #tpu.memory_space<vmem>>, vector<8x128xf32>
      %c0_7 = arith.constant 0 : index
      %c0_8 = arith.constant 0 : index
      %c0_9 = arith.constant 0 : index
      %17 = vector.load %arg4[%c0_7, %c0_8, %c0_9] : memref<1x8x128xf32, #tpu.memory_space<vmem>>, vector<1x8x128xf32>
      %18 = vector.shape_cast %17 : vector<1x8x128xf32> to vector<8x128xf32>
      %19 = vector.shape_cast %16 : vector<8x128xf32> to vector<1x8x128xf32>
      tpu.vector_store %arg4[%c0_7, %c0_8, %c0_9], %19 {strides = array<i32>} : memref<1x8x128xf32, #tpu.memory_space<vmem>>, vector<1x8x128xf32>,
      %c0_10 = arith.constant 0 : index
      %c0_11 = arith.constant 0 : index
      %20 = vector.load %arg7[%c0_10, %c0_11] : memref<8x128xf32, #tpu.memory_space<vmem>>, vector<8x128xf32>
      %c0_12 = arith.constant 0 : index
      %c0_13 = arith.constant 0 : index
      %c0_14 = arith.constant 0 : index
      %21 = vector.load %arg5[%c0_12, %c0_13, %c0_14] : memref<1x8x128xf32, #tpu.memory_space<vmem>>, vector<1x8x128xf32>
      %22 = vector.shape_cast %21 : vector<1x8x128xf32> to vector<8x128xf32>
      %23 = vector.shape_cast %20 : vector<8x128xf32> to vector<1x8x128xf32>
      tpu.vector_store %arg5[%c0_12, %c0_13, %c0_14], %23 {strides = array<i32>} : memref<1x8x128xf32, #tpu.memory_space<vmem>>, vector<1x8x128xf32>,
    } else {
    }
    return
  }
  func.func @transform_0(%arg0: i32, %arg1: i32) -> (i32, i32) {
    %c1_i32 = arith.constant 1 : i32
    %0 = arith.muli %arg0, %c1_i32 : i32
    %1 = arith.addi %0, %arg1 : i32
    %c0_i32 = arith.constant 0 : i32
    %2 = arith.minsi %1, %c0_i32 : i32
    %c0_i32_0 = arith.constant 0 : i32
    %c0_i32_1 = arith.constant 0 : i32
    return %2, %c0_i32_0 : i32, i32
  }
  func.func @transform_1(%arg0: i32, %arg1: i32) -> (i32, i32) {
    %c1_i32 = arith.constant 1 : i32
    %0 = arith.muli %arg0, %c1_i32 : i32
    %1 = arith.addi %0, %arg1 : i32
    %c0_i32 = arith.constant 0 : i32
    %2 = arith.minsi %1, %c0_i32 : i32
    %c0_i32_0 = arith.constant 0 : i32
    %c0_i32_1 = arith.constant 0 : i32
    return %2, %c0_i32_0 : i32, i32
  }
  func.func @transform_2(%arg0: i32, %arg1: i32) -> (i32, i32, i32) {
    %c0_i32 = arith.constant 0 : i32
    %c0_i32_0 = arith.constant 0 : i32
    %c0_i32_1 = arith.constant 0 : i32
    return %arg0, %c0_i32, %c0_i32_0 : i32, i32, i32
  }
  func.func @transform_3(%arg0: i32, %arg1: i32) -> (i32, i32, i32) {
    %c0_i32 = arith.constant 0 : i32
    %c0_i32_0 = arith.constant 0 : i32
    %c0_i32_1 = arith.constant 0 : i32
    return %arg0, %c0_i32, %c0_i32_0 : i32, i32, i32
  }
}

</mosaic_0001>

<bundles_post_ra>
// kernel: tpu_custom_call.1
= control target key start
LH: loop header
LB: loop body
LE: loop exit
PB: predicated region body
PF: predicated region fallthrough
CT: control target
= control target key end

     0   :  { %9 = vsyncpa [#allocation5], 0  ;;  %s345_s0 = inlined_call_operand.hbm [shape: f32[4,128], index: 0, kind: input, shape index: {}]   ;;  %s346_s1 = inlined_call_operand.hbm [shape: f32[4,128], index: 1, kind: input, shape index: {}]   ;;  %s347_s2 = inlined_call_operand.hbm [shape: f32[1,8,128], index: 2, kind: output, shape index: {0}]   ;;  %s348_s3 = inlined_call_operand.hbm [shape: f32[1,8,128], index: 3, kind: output, shape index: {1}]  }
   0x1   :  { %10 = vsyncpa [#allocation8], 0 }
   0x2   :  { %11 = vsyncpa [#allocation6], 0 }
   0x3   :  { %12 = vsyncpa [#allocation11], 0 }
   0x4   :  { %23 = vsyncadd [#allocation5], 64  ;;  %s28_s14 = sshll.u32 %s345_s0, 4  ;;  %s305_s15 = smov [#allocation4]   ;;  %s29_s14 = int_to_ptr.hbm [resolvable:$true] %s28_s14 }
   0x5   :  { %s30_s16 = sshll.u32 %s305_s15, 4  ;;  %s306_s17 = smov 64   ;;  %s31_s16 = int_to_ptr.vmem [resolvable:$true] %s30_s16 }
   0x6   :  { %s307_s18 = smov 4  }
   0x7   :  { %36 = dma.hbm_to_vmem [thread:$0]  %s29_s14, 64, %s31_s16, [#allocation5], %s306_s17, %s306_s17, %s307_s18  }
   0x8   :  { %47 = vsyncadd [#allocation8], 64  ;;  %s52_s21 = sshll.u32 %s346_s1, 4  ;;  %s308_s22 = smov [#allocation7]   ;;  %s53_s21 = int_to_ptr.hbm [resolvable:$true] %s52_s21 }
   0x9   :  { %s54_s23 = sshll.u32 %s308_s22, 4  ;;  %s55_s23 = int_to_ptr.vmem [resolvable:$true] %s54_s23 }
   0xa   :  { %60 = dma.hbm_to_vmem [thread:$0]  %s53_s21, 64, %s55_s23, [#allocation8], %s306_s17, %s306_s17, %s307_s18  }
   0xb   :  { %297 = dma.done.wait [#allocation5], 128  }
   0xc   :  { %298 = vsyncadd [#allocation5], 4294967168 }
   0xd   :  { %299 = dma.done.wait [#allocation8], 128  }
   0xe   :  { %300 = vsyncadd [#allocation8], 4294967168  ;;  %v130_v0 = vlaneseq  ;;  %s309_s0 = smov [#allocation9]   ;;  %s160_s27 = sshll.u32 %s347_s2, 4  ;;  %v118_v2 = vld [vmem:[#allocation4] sm:$0xff]  ;;  %v119_v11 = vld [vmem:[#allocation7] sm:$0xff]  ;;  %s161_s27 = int_to_ptr.hbm [resolvable:$true] %s160_s27 }
   0xf   :  { %s158_s24 = sshll.u32 %s309_s0, 4  ;;  %197 = vlog2.f32 %v118_v2  ;;  %v123_v3 = vsub.f32 1.0, %v118_v2  ;;  %s310_s1 = smov [#allocation10]   ;;  %s159_s24 = int_to_ptr.vmem [resolvable:$true] %s158_s24 }
  0x10   :  { %v131_v1 = vshrl.u32 %v130_v0, 7  ;;  %s169_s2 = sshll.u32 %s310_s1, 4  ;;  %s171_s30 = sshll.u32 %s348_s3, 4  ;;  %s170_s2 = int_to_ptr.vmem [resolvable:$true] %s169_s2  ;;  %s172_s30 = int_to_ptr.hbm [resolvable:$true] %s171_s30 }
  0x11   :  { %199 = vlog2.f32 %v123_v3 }
  0x12   :  { %vm135_vm0 = vcmp.lt.s32.totalorder %v131_v1, 4 }
  0x13   :  { %v136_v4 = vsel %vm135_vm0, %v118_v2, 0.0 }
  0x14   :  { %150 = vst [vmem:[#allocation9] sm:$0xff] %v136_v4 }
  0x15   :  { %163 = dma.vmem_to_hbm [thread:$0]  %s159_s24, 128, %s161_s27, [#allocation6]   ;;  %v198_v5 = vpop.eup %197 }
  0x16   :  { %v121_v6 = vmul.f32 0.6931472, %v198_v5 }
  0x17   :  { %v200_v7 = vpop.eup %199 }
  0x18   :  { %v122_v8 = vmax.f32 %v121_v6, -100.0  ;;  %v125_v9 = vmul.f32 0.6931472, %v200_v7 }
  0x1a   :  { %v126_v10 = vmax.f32 %v125_v9, -100.0 }
  0x1c   :  { %v127_v12 = vsub.f32 %v122_v8, %v126_v10 }
  0x1e   :  { %v128_v13 = vmul.f32 %v127_v12, %v119_v11 }
  0x20   :  { %v129_v14 = vadd.f32 %v128_v13, %v126_v10 }
  0x22   :  { %v137_v15 = vsel %vm135_vm0, %v129_v14, 0.0 }
  0x23   :  { %152 = vst [vmem:[#allocation10] sm:$0xff] %v137_v15 }
  0x24   :  { %174 = dma.vmem_to_hbm [thread:$0]  %s170_s2, 128, %s172_s30, [#allocation11]  }
  0x25   :  { %301 = dma.done.wait [#allocation6], 128  }
  0x26   :  { %302 = vsyncadd [#allocation6], 4294967168 }
  0x27   :  { %303 = dma.done.wait [#allocation11], 128  }
  0x28   :  { %304 = vsyncadd [#allocation11], 4294967168 }
  0x29   :  { %183 = vsyncpa [#allocation5], 1 }
  0x2a   :  { %184 = vsyncpa [#allocation8], 1 }
  0x2b   :  { %185 = vsyncpa [#allocation6], 1 }
  0x2c   :  { %186 = vsyncpa [#allocation11], 1 }

</bundles_post_ra>
